<compile_context>
chip_gen: v7x
topology: tpu7x:2x2x1
jax: 0.10.0
libtpu: 0.0.40
codegen_flags: <defaults>
</compile_context>

<pallas_src>
import functools
import math

import jax
import jax.numpy as jnp
from jax.experimental import pallas as pl
from jax.experimental.pallas import tpu as pltpu


# ----------------------------------------------------------------------------
# Buffer init (mirrors the PyTorch __init__ / register_buffer, done ONCE).
# ----------------------------------------------------------------------------
def make_positional_encoding(d_model: int, max_len: int = 5000) -> jnp.ndarray:
    """Returns pe of shape (max_len, d_model), float32.

    The PyTorch buffer is (max_len, 1, d_model); the singleton batch axis is
    handled by in-kernel broadcasting instead of being materialized in HBM.
    """
    position = jnp.arange(0, max_len, dtype=jnp.float32)[:, None]            # (max_len, 1)
    div_term = jnp.exp(
        jnp.arange(0, d_model, 2, dtype=jnp.float32) * (-math.log(10000.0) / d_model)
    )                                                                         # (d_model/2,)
    pe = jnp.zeros((max_len, d_model), dtype=jnp.float32)
    pe = pe.at[:, 0::2].set(jnp.sin(position * div_term))
    pe = pe.at[:, 1::2].set(jnp.cos(position * div_term))
    return pe


# ----------------------------------------------------------------------------
# Kernel
# ----------------------------------------------------------------------------
def _add_pe_kernel(x_ref, pe_ref, o_ref, *, tile_b: int, d_model: int):
    """x_ref/o_ref: (tile_s, tile_b*d_model); pe_ref: (tile_s, d_model).

    Broadcasts the pe tile over the tile_b batch entries packed along the lane
    axis of the x block (static per-batch slices -> pure VPU adds; pe is never
    replicated in HBM).
    """
    pe_tile = pe_ref[...].astype(jnp.float32)                 # (tile_s, D)
    for b in range(tile_b):                                    # static, small
        sl = slice(b * d_model, (b + 1) * d_model)
        o_ref[:, sl] = (x_ref[:, sl].astype(jnp.float32) + pe_tile).astype(o_ref.dtype)


# ----------------------------------------------------------------------------
# Wrapper
# ----------------------------------------------------------------------------
_MAX_BATCH_PER_BLOCK = 64        # bounds unrolled in-kernel batch loop length


def _round_up(n: int, m: int) -> int:
    return -(-n // m) * m


def _sublane_multiple(dtype) -> int:
    # Packed sublane multiple: 8 rows f32, 16 bf16/f16, 32 int8/fp8.
    return max(8, 32 // jnp.dtype(dtype).itemsize)


def _num_tensorcores() -> int:
    """Best-effort TensorCore count per Pallas device (v7x: 2, else 1)."""
    try:
        kind = jax.devices()[0].device_kind.lower()
    except Exception:
        return 1
    return 2 if "v7" in kind else 1


def positional_encoding_forward(x: jnp.ndarray,
                                pe: jnp.ndarray,
                                *,
                                target_tile_bytes: int = 8 * 1024 * 1024,
                                donate_x: bool = False) -> jnp.ndarray:
    """x: (S, B, D); pe: (max_len, D) f32 buffer (or (max_len, 1, D)).

    Returns x + pe[:S] broadcast over batch, same shape/dtype as x.
    """
    S, B, D = x.shape
    L = B * D

    if pe.ndim == 3:                       # raw torch-style (max_len, 1, D) buffer
        pe = pe.reshape(pe.shape[0], pe.shape[2])   # metadata-only reshape
    assert pe.ndim == 2 and pe.shape[1] == D, "pe must be (max_len, d_model)"
    assert S <= pe.shape[0], "sequence length exceeds max_len of the pe table"

    itemsize = jnp.dtype(x.dtype).itemsize
    sub = _sublane_multiple(x.dtype)

    # -- tile_b: batch entries per block along the lane axis -----------------
    # Prefer the full batch (1 block wide).  Split it (second grid dim) only
    # when even a minimum-height full-width block exceeds the byte budget, or
    # when the full batch would make the unrolled in-kernel loop too long.
    if B <= _MAX_BATCH_PER_BLOCK and sub * L * itemsize <= target_tile_bytes:
        tile_b = B
    else:
        cap = max(1, min(B, _MAX_BATCH_PER_BLOCK,
                         target_tile_bytes // max(1, sub * D * itemsize)))
        tile_b = 0
        for c in range(cap, 0, -1):
            # Partial-width lane blocks must be 128-aligned (or full width).
            if (c * D) % 128 == 0 or c == B:
                tile_b = c
                break
        if tile_b == 0:
            # No 128-aligned partial width exists for this D; fall back to the
            # full width and let the VMEM limit scale (rare, odd-D case).
            tile_b = B
    block_w = tile_b * D
    num_b_blocks = -(-B // tile_b)

    # -- tile_s: sequence rows per block (packed-sublane multiple) -----------
    rows_budget = max(sub, (target_tile_bytes // max(1, block_w * itemsize)) // sub * sub)
    tile_s = max(sub, min(rows_budget, _round_up(S, sub)))
    if _num_tensorcores() >= 2 and S > sub:
        # Multi-TC chip (v7x): guarantee >=2 grid steps so both cores get work.
        # TODO(synk): make the 2-way split explicit with pl.core_map /
        # pltpu.CORE_PARALLEL once verified in a v7x trace.
        tile_s = min(tile_s, max(sub, _round_up(-(-S // 2), sub)))
    num_s_blocks = -(-S // tile_s)        # ceil-div; edge blocks masked by Pallas

    # -- explicit VMEM budget (x in + out double-buffered, small pe tile) ----
    x_tile_bytes = tile_s * block_w * itemsize
    pe_tile_bytes = tile_s * D * jnp.dtype(pe.dtype).itemsize
    need = 4 * x_tile_bytes + 2 * pe_tile_bytes
    vmem_limit = int(min(max(need + (8 << 20), 32 << 20), 48 << 20))  # <=48 MiB for v7x
    vmem_limit = max(vmem_limit, need + (4 << 20))  # never under-provision

    x2 = x.reshape(S, L)                   # free row-major reshape, lane-dense

    kernel = functools.partial(_add_pe_kernel, tile_b=tile_b, d_model=D)

    out2 = pl.pallas_call(
        kernel,
        out_shape=jax.ShapeDtypeStruct((S, L), x.dtype),
        grid_spec=pltpu.PrefetchScalarGridSpec(
            num_scalar_prefetch=0,
            grid=(num_s_blocks, num_b_blocks),
            in_specs=[
                pl.BlockSpec((tile_s, block_w), lambda i, j: (i, j)),   # x block
                pl.BlockSpec((tile_s, D), lambda i, j: (i, 0)),         # pe rows [:S]
            ],
            out_specs=pl.BlockSpec((tile_s, block_w), lambda i, j: (i, j)),
        ),
        compiler_params=pltpu.CompilerParams(
            dimension_semantics=("parallel", "parallel"),
            vmem_limit_bytes=vmem_limit,
        ),
        input_output_aliases={0: 0} if donate_x else {},
    )(x2, pe)

    return out2.reshape(S, B, D)


# ----------------------------------------------------------------------------
# Demo / self-check
# ----------------------------------------------------------------------------
if __name__ == "__main__":
    # Small shapes consistent with the module: seq=8, batch=2, d_model=32.
    S, B, D = 8, 2, 32
    MAX_LEN = 5000

    key = jax.random.PRNGKey(0)
    x = jax.random.normal(key, (S, B, D), dtype=jnp.float32)

    pe = make_positional_encoding(D, MAX_LEN)          # (max_len, D) f32 buffer

    out = positional_encoding_forward(x, pe)
    out = jax.block_until_ready(out)

    # Reference check (pure JAX, same semantics as the PyTorch forward).
    ref = x + pe[:S][:, None, :]
    assert out.shape == (S, B, D)
    assert out.dtype == x.dtype
    assert jnp.allclose(out, ref, atol=1e-6, rtol=1e-6), "mismatch vs reference"

    print("KERNEL_OK")
</pallas_src>

<mosaic_0001>
module attributes {stable_mosaic.version = 11 : i64} {
  func.func @_add_pe_kernel(%arg0: i32, %arg1: i32, %arg2: memref<8x64xf32, #tpu.memory_space<vmem>>, %arg3: memref<8x32xf32, #tpu.memory_space<vmem>>, %arg4: memref<8x64xf32, #tpu.memory_space<vmem>>) attributes {dimension_semantics = [#tpu.dimension_semantics<parallel>, #tpu.dimension_semantics<parallel>], iteration_bounds = array<i64: 1, 1>, scalar_prefetch = 0 : i64, scratch_operands = 0 : i64, tpu.core_type = #tpu.core_type<tc>, window_params = [{transform_indices = @transform_0, window_bounds = array<i64: 8, 64>}, {transform_indices = @transform_1, window_bounds = array<i64: 8, 32>}, {transform_indices = @transform_2, window_bounds = array<i64: 8, 64>}]} {
    %c0 = arith.constant 0 : index
    %c0_0 = arith.constant 0 : index
    %0 = vector.load %arg3[%c0, %c0_0] : memref<8x32xf32, #tpu.memory_space<vmem>>, vector<8x32xf32>
    %c0_1 = arith.constant 0 : index
    %c0_2 = arith.constant 0 : index
    %1 = vector.load %arg2[%c0_1, %c0_2] : memref<8x64xf32, #tpu.memory_space<vmem>>, vector<8x32xf32>
    %2 = arith.addf %1, %0 : vector<8x32xf32>
    %c0_3 = arith.constant 0 : index
    %c0_4 = arith.constant 0 : index
    %3 = vector.load %arg4[%c0_3, %c0_4] : memref<8x64xf32, #tpu.memory_space<vmem>>, vector<8x32xf32>
    tpu.vector_store %arg4[%c0_3, %c0_4], %2 {strides = array<i32>} : memref<8x64xf32, #tpu.memory_space<vmem>>, vector<8x32xf32>,
    %c0_5 = arith.constant 0 : index
    %c32 = arith.constant 32 : index
    %4 = vector.load %arg2[%c0_5, %c32] : memref<8x64xf32, #tpu.memory_space<vmem>>, vector<8x32xf32>
    %5 = arith.addf %4, %0 : vector<8x32xf32>
    %c0_6 = arith.constant 0 : index
    %c32_7 = arith.constant 32 : index
    %6 = vector.load %arg4[%c0_6, %c32_7] : memref<8x64xf32, #tpu.memory_space<vmem>>, vector<8x32xf32>
    tpu.vector_store %arg4[%c0_6, %c32_7], %5 {strides = array<i32>} : memref<8x64xf32, #tpu.memory_space<vmem>>, vector<8x32xf32>,
    return
  }
  func.func @transform_0(%arg0: i32, %arg1: i32) -> (i32, i32) {
    %c0_i32 = arith.constant 0 : i32
    return %arg0, %arg1 : i32, i32
  }
  func.func @transform_1(%arg0: i32, %arg1: i32) -> (i32, i32) {
    %c0_i32 = arith.constant 0 : i32
    %c0_i32_0 = arith.constant 0 : i32
    return %arg0, %c0_i32 : i32, i32
  }
  func.func @transform_2(%arg0: i32, %arg1: i32) -> (i32, i32) {
    %c0_i32 = arith.constant 0 : i32
    return %arg0, %arg1 : i32, i32
  }
}

</mosaic_0001>

<bundles_post_ra>
// kernel: tpu_custom_call.1
= control target key start
LH: loop header
LB: loop body
LE: loop exit
PB: predicated region body
PF: predicated region fallthrough
CT: control target
= control target key end

     0   :  { %vm15_vm0 = vcmask 261120   ;;  %s100_s0 = inlined_call_operand.vmem [shape: f32[8,64], index: 0, kind: input, shape index: {}]   ;;  %s101_s1 = inlined_call_operand.vmem [shape: f32[5000,32], index: 1, kind: input, shape index: {}]   ;;  %s102_s2 = inlined_call_operand.hbm [shape: f32[8,64], index: 2, kind: output, shape index: {}]  }
   0x1   :  { %v12_v0 = vld [vmem:[%s101_s1] sm:$0xff] }
   0x2   :  { %v13_v1 = vld [vmem:[%s100_s0] sm:$0xff] }
   0x3   :  { %7 = vsyncpa [#allocation3], 0  ;;  %v14_v2 = vadd.f32 %v13_v1, %v12_v0  ;;  %s65_s13 = smov 32   ;;  %s66_s14 = smov [#allocation2]   ;;  %vm23_vm1 = vcmask 523520  }
   0x4   :  { %19 = vrot.lane.b32.xlu0 %v12_v0, %s65_s13  ;;  %s31_s15 = sshll.u32 %s66_s14, 4  ;;  %s32_s15 = int_to_ptr.vmem [resolvable:$true] %s31_s15 }
   0x5   :  { %16 = vst.msk [vmem:[#allocation2] sm:$0xff] %vm15_vm0, %v14_v2  ;;  %s41_s16 = scalar_lea.vmem %s32_s15, 128  ;;  %p46_p1 = scmp.lt.s32.totalorder %s32_s15, %s32_s15 }
   0x6   :  { %p42_p0 = scmp.ne.s32.totalorder %s32_s15, %s41_s16  ;;  %p47_p2 = scmp.lt.s32.totalorder %s41_s16, %s41_s16 }
   0x8   :  { %p48_p3 = por %p47_p2, %p46_p1 }
   0xa   :  { %p49_p4 = pnand %p48_p3, %p42_p0 }
  0x76   :  { %v20_v3 = vpop.permute.xlu0 %19 }
  0x77   :  { %v22_v4 = vadd.f32 %v20_v3, %v13_v1 }
  0x79   :  { %24 = vst.msk [vmem:[#allocation2] sm:$0xff] %vm23_vm1, %v22_v4 }
  0x7a   :  { %52 = shalt.err (!%p49_p4)
}
  0x7b   :  { %s53_s17 = scalar_lea.hbm %s102_s2, 128 }
  0x7c   :  { %p54_p5 = scmp.ne.s32.totalorder %s102_s2, %s53_s17  ;;  %p57_p6 = scmp.lt.u32.totalorder %s53_s17, %s102_s2 }
  0x7e   :  { %p59_p7 = pnand %p57_p6, %p54_p5 }
  0x80   :  { %62 = shalt.err (!%p59_p7)
}
  0x81   :  { %34 = dma.vmem_to_hbm [thread:$0]  %s32_s15, 128, %s102_s2, [#allocation3]  }
  0x82   :  { %63 = dma.done.wait [#allocation3], 128  }
  0x83   :  { %64 = vsyncadd [#allocation3], 4294967168 }
  0x84   :  { %38 = vsyncpa [#allocation3], 1 }

</bundles_post_ra>
